<compile_context>
chip_gen: v7x
topology: tpu7x:2x2x1
jax: 0.10.0
libtpu: 0.0.40
codegen_flags: <defaults>
</compile_context>

<pallas_src>
import functools
import math

import jax
import jax.numpy as jnp
from jax import lax
from jax.experimental import pallas as pl
from jax.experimental.pallas import tpu as pltpu

_LANES = 128
_CHUNK_ROWS = 512                      # in-kernel accumulation chunk (multiple of 8)
_TARGET_BLOCK_BYTES = 4 * 1024 * 1024  # per-stream DMA block target
_SIMPLE_ROWS = 2048                    # <= this: single full block, no chunk loop
_VMEM_LIMIT = 32 * 1024 * 1024         # v7x-safe (64 MiB/TC); v5e/v6e have slack


def _cdiv(a, b):
    return -(-a // b)


def _wmse_kernel(o_ref, t_ref, *rest, rows, block_rows, chunk_rows,
                 n_blocks, n_inner, need_mask, has_weight, acc_rows):
    if has_weight:
        w_ref, out_ref = rest
    else:
        (out_ref,) = rest
        w_ref = None

    o_idx = pl.program_id(0)           # "parallel" (megacore) axis
    i_idx = pl.program_id(1)           # "arbitrary" accumulation axis
    b = o_idx * n_inner + i_idx        # linear block index (never duplicated)

    @pl.when(i_idx == 0)
    def _():
        out_ref[...] = jnp.zeros_like(out_ref)

    def partial_sum(lo, n_rows, masked):
        # f32 sum of weight * (o - t)**2 over rows [lo, lo + n_rows) of this
        # block, reduced to an (acc_rows, 128) lane-resident partial.
        o = o_ref[pl.ds(lo, n_rows), :].astype(jnp.float32)
        t = t_ref[pl.ds(lo, n_rows), :].astype(jnp.float32)
        d = o - t
        v = d * d
        if has_weight:
            v = w_ref[pl.ds(lo, n_rows), :].astype(jnp.float32) * v
        if masked:
            row = lax.broadcasted_iota(jnp.int32, (n_rows, _LANES), 0)
            v = jnp.where(b * block_rows + lo + row < rows, v, 0.0)
        if acc_rows == 8:
            # Pure vadd tree across sublane groups; no cross-sublane reduce
            # per step (the 8->1 reduce happens once, outside the kernel).
            return v.reshape(-1, 8, _LANES).sum(axis=0)
        return jnp.sum(v, axis=0, keepdims=True)

    if chunk_rows is None:
        def block_sum(masked):
            return partial_sum(0, block_rows, masked)
    else:
        n_chunks = block_rows // chunk_rows

        def block_sum(masked):
            def body(c, acc):
                lo = pl.multiple_of(c * chunk_rows, chunk_rows)
                return acc + partial_sum(lo, chunk_rows, masked)
            return lax.fori_loop(0, n_chunks, body,
                                 jnp.zeros((acc_rows, _LANES), jnp.float32))

    if not need_mask:
        out_ref[...] += block_sum(False)[None]
    elif n_blocks == 1:
        out_ref[...] += block_sum(True)[None]
    else:
        # Only the ragged final block pays for the iota/compare/select mask.
        @pl.when(b == n_blocks - 1)
        def _():
            out_ref[...] += block_sum(True)[None]

        @pl.when(b < n_blocks - 1)
        def _():
            out_ref[...] += block_sum(False)[None]


def _plan_blocks(rows, max_block_rows):
    """Pick (block_rows, n_blocks, n_outer, n_inner, chunk_rows, need_mask, acc_rows)."""
    if rows <= _SIMPLE_ROWS:
        acc_rows = 8 if rows % 8 == 0 else 1
        return rows, 1, 1, 1, None, False, acc_rows

    base = min(max_block_rows, (rows // _CHUNK_ROWS) * _CHUNK_ROWS)
    best = None
    for cand in range(base, _SIMPLE_ROWS - 1, -_CHUNK_ROWS):
        nb = _cdiv(rows, cand)
        exact = (rows % cand == 0)                      # no ragged block at all
        even = (nb % 2 == 0) or nb == 1                 # duplicate-free 2-way split
        score = (exact and even, even, exact, cand)     # prefer big blocks last
        if best is None or score > best[0]:
            best = (score, cand, nb)
    _, block_rows, n_blocks = best
    n_outer = 2 if (n_blocks >= 2 and n_blocks % 2 == 0) else 1
    n_inner = n_blocks // n_outer
    need_mask = (rows % block_rows) != 0
    return block_rows, n_blocks, n_outer, n_inner, _CHUNK_ROWS, need_mask, 8


def weighted_mse_loss(output, target, weight):
    """mean(weight * (output - target) ** 2), matching torch semantics."""
    output = jnp.asarray(output)
    target = jnp.asarray(target)
    weight = jnp.asarray(weight)

    shape = jnp.broadcast_shapes(output.shape, target.shape, weight.shape)
    out_dtype = jnp.result_type(output.dtype, target.dtype, weight.dtype)
    total_n = math.prod(shape)

    output = jnp.broadcast_to(output, shape)   # no-op in the usual same-shape case
    target = jnp.broadcast_to(target, shape)

    # Scalar weight: fold into the final scale instead of streaming it from HBM.
    if weight.size == 1:
        weight_scalar = weight.reshape(()).astype(jnp.float32)
        w_full = None
    else:
        weight_scalar = None
        # TODO(synk): a low-rank (e.g. per-channel) weight could be fed as a small
        # resident VMEM block instead of materializing the full broadcast.
        w_full = jnp.broadcast_to(weight, shape)
    has_weight = w_full is not None

    o_flat = output.reshape(-1)
    t_flat = target.reshape(-1)
    w_flat = w_full.reshape(-1) if has_weight else None

    main_n = (total_n // _LANES) * _LANES
    rows = main_n // _LANES

    acc = jnp.float32(0.0)
    if rows > 0:
        # Lane-dense (rows, 128) view of the 128-aligned prefix (a free reshape
        # when total_n is already 128-aligned, which is the common case here).
        streams = [o_flat[:main_n].reshape(rows, _LANES),
                   t_flat[:main_n].reshape(rows, _LANES)]
        if has_weight:
            streams.append(w_flat[:main_n].reshape(rows, _LANES))

        max_item = max(s.dtype.itemsize for s in streams)
        max_block_rows = max(
            _CHUNK_ROWS,
            (_TARGET_BLOCK_BYTES // (_LANES * max_item))
            // _CHUNK_ROWS * _CHUNK_ROWS)

        (block_rows, n_blocks, n_outer, n_inner,
         chunk_rows, need_mask, acc_rows) = _plan_blocks(rows, max_block_rows)

        def in_map(o_idx, i_idx):
            return (o_idx * n_inner + i_idx, 0)

        kernel = functools.partial(
            _wmse_kernel, rows=rows, block_rows=block_rows,
            chunk_rows=chunk_rows, n_blocks=n_blocks, n_inner=n_inner,
            need_mask=need_mask, has_weight=has_weight, acc_rows=acc_rows)

        partials = pl.pallas_call(
            kernel,
            out_shape=jax.ShapeDtypeStruct((n_outer, acc_rows, _LANES),
                                           jnp.float32),
            grid_spec=pl.GridSpec(
                grid=(n_outer, n_inner),
                in_specs=[pl.BlockSpec((block_rows, _LANES), in_map)
                          for _ in streams],
                out_specs=pl.BlockSpec((1, acc_rows, _LANES),
                                       lambda o_idx, i_idx: (o_idx, 0, 0)),
            ),
            compiler_params=pltpu.CompilerParams(
                # Outer split is only emitted duplicate-free (even block count);
                # it is harmless on single-TC parts (v5e/v6e) and shards across
                # the two v7x TensorCores.
                dimension_semantics=("parallel", "arbitrary"),
                vmem_limit_bytes=_VMEM_LIMIT,
            ),
        )(*streams)
        acc = jnp.sum(partials)

    tail_n = total_n - main_n
    if tail_n > 0:
        # Sub-128 ragged tail in plain JAX.  (For non-128-aligned sizes the
        # prefix slices above may cost an extra copy; 128-aligned sizes — the
        # common case for this module — are unaffected.)
        od = o_flat[main_n:].astype(jnp.float32)
        td = t_flat[main_n:].astype(jnp.float32)
        dd = od - td
        sq = dd * dd
        if has_weight:
            sq = w_flat[main_n:].astype(jnp.float32) * sq
        acc = acc + jnp.sum(sq)

    if weight_scalar is not None:
        acc = acc * weight_scalar
    # NOTE: an in-kernel (1,1) SMEM finalize could drop these last two tiny XLA
    # ops for the latency-bound small-tensor case; kept outside for simplicity.
    return (acc / jnp.float32(total_n)).astype(out_dtype)


if __name__ == "__main__":
    key = jax.random.PRNGKey(0)

    def check(k, shape, weight_shape=None, dtype=jnp.float32):
        k1, k2, k3 = jax.random.split(k, 3)
        output = jax.random.normal(k1, shape, dtype=dtype)
        target = jax.random.normal(k2, shape, dtype=dtype)
        wshape = shape if weight_shape is None else weight_shape
        weight = jax.random.uniform(k3, wshape, dtype=dtype)
        loss = weighted_mse_loss(output, target, weight)
        jax.block_until_ready(loss)
        ref = jnp.mean(weight * (output - target) ** 2)
        assert jnp.allclose(loss, ref, rtol=1e-4, atol=1e-6), (shape, loss, ref)

    keys = jax.random.split(key, 6)
    check(keys[0], (2, 4, 16, 16))                        # spec shape: single small block
    check(keys[1], (3, 5, 7, 9))                          # ragged size: JAX tail path
    check(keys[2], (3, 8, 256, 256))                      # multi-block, even split, chunked
    check(keys[3], (2, 4, 16, 16), weight_shape=())       # scalar weight: 2-stream kernel
    check(keys[4], (3, 1000, 128))                        # ragged last block (masked)
    check(keys[5], (2, 4, 16, 16), weight_shape=(1, 4, 1, 1))  # broadcast weight fallback
    print("KERNEL_OK")
</pallas_src>

<mosaic_0001>
module attributes {stable_mosaic.version = 11 : i64} {
  func.func @_wmse_kernel(%arg0: i32, %arg1: i32, %arg2: memref<16x128xf32, #tpu.memory_space<vmem>>, %arg3: memref<16x128xf32, #tpu.memory_space<vmem>>, %arg4: memref<16x128xf32, #tpu.memory_space<vmem>>, %arg5: memref<1x8x128xf32, #tpu.memory_space<vmem>>) attributes {dimension_semantics = [#tpu.dimension_semantics<parallel>, #tpu.dimension_semantics<arbitrary>], iteration_bounds = array<i64: 1, 1>, scalar_prefetch = 0 : i64, scratch_operands = 0 : i64, tpu.core_type = #tpu.core_type<tc>, window_params = [{transform_indices = @transform_0, window_bounds = array<i64: 16, 128>}, {transform_indices = @transform_1, window_bounds = array<i64: 16, 128>}, {transform_indices = @transform_2, window_bounds = array<i64: 16, 128>}, {transform_indices = @transform_3, window_bounds = array<i64: 1, 8, 128>}]} {
    %c0_i32 = arith.constant 0 : i32
    %0 = arith.cmpi eq, %arg1, %c0_i32 : i32
    %1 = arith.extui %0 : i1 to i32
    %c0_i32_0 = arith.constant 0 : i32
    %2 = arith.cmpi ne, %1, %c0_i32_0 : i32
    scf.if %2 {
      %cst_12 = arith.constant 0.000000e+00 : f32
      %15 = vector.broadcast %cst_12 : f32 to vector<1x8x128xf32>
      %c0_13 = arith.constant 0 : index
      %c0_14 = arith.constant 0 : index
      %c0_15 = arith.constant 0 : index
      %16 = vector.load %arg5[%c0_13, %c0_14, %c0_15] : memref<1x8x128xf32, #tpu.memory_space<vmem>>, vector<1x8x128xf32>
      tpu.vector_store %arg5[%c0_13, %c0_14, %c0_15], %15 {strides = array<i32>} : memref<1x8x128xf32, #tpu.memory_space<vmem>>, vector<1x8x128xf32>,
    } else {
    }
    %c0 = arith.constant 0 : index
    %c0_1 = arith.constant 0 : index
    %c0_2 = arith.constant 0 : index
    %3 = vector.load %arg5[%c0, %c0_1, %c0_2] : memref<1x8x128xf32, #tpu.memory_space<vmem>>, vector<1x8x128xf32>
    %c0_3 = arith.constant 0 : index
    %c0_4 = arith.constant 0 : index
    %4 = vector.load %arg2[%c0_3, %c0_4] : memref<16x128xf32, #tpu.memory_space<vmem>>, vector<16x128xf32>
    %c0_5 = arith.constant 0 : index
    %c0_6 = arith.constant 0 : index
    %5 = vector.load %arg3[%c0_5, %c0_6] : memref<16x128xf32, #tpu.memory_space<vmem>>, vector<16x128xf32>
    %6 = arith.subf %4, %5 : vector<16x128xf32>
    %7 = arith.mulf %6, %6 : vector<16x128xf32>
    %c0_7 = arith.constant 0 : index
    %c0_8 = arith.constant 0 : index
    %8 = vector.load %arg4[%c0_7, %c0_8] : memref<16x128xf32, #tpu.memory_space<vmem>>, vector<16x128xf32>
    %9 = arith.mulf %8, %7 : vector<16x128xf32>
    %10 = vector.shape_cast %9 : vector<16x128xf32> to vector<2x8x128xf32>
    %cst = arith.constant dense<0.000000e+00> : vector<8x128xf32>
    %11 = vector.multi_reduction <add>, %10, %cst [0] : vector<2x8x128xf32> to vector<8x128xf32>
    %12 = vector.shape_cast %11 : vector<8x128xf32> to vector<1x8x128xf32>
    %13 = arith.addf %3, %12 : vector<1x8x128xf32>
    %c0_9 = arith.constant 0 : index
    %c0_10 = arith.constant 0 : index
    %c0_11 = arith.constant 0 : index
    %14 = vector.load %arg5[%c0_9, %c0_10, %c0_11] : memref<1x8x128xf32, #tpu.memory_space<vmem>>, vector<1x8x128xf32>
    tpu.vector_store %arg5[%c0_9, %c0_10, %c0_11], %13 {strides = array<i32>} : memref<1x8x128xf32, #tpu.memory_space<vmem>>, vector<1x8x128xf32>,
    return
  }
  func.func @transform_0(%arg0: i32, %arg1: i32) -> (i32, i32) {
    %c1_i32 = arith.constant 1 : i32
    %0 = arith.muli %arg0, %c1_i32 : i32
    %1 = arith.addi %0, %arg1 : i32
    %c0_i32 = arith.constant 0 : i32
    %c0_i32_0 = arith.constant 0 : i32
    return %1, %c0_i32 : i32, i32
  }
  func.func @transform_1(%arg0: i32, %arg1: i32) -> (i32, i32) {
    %c1_i32 = arith.constant 1 : i32
    %0 = arith.muli %arg0, %c1_i32 : i32
    %1 = arith.addi %0, %arg1 : i32
    %c0_i32 = arith.constant 0 : i32
    %c0_i32_0 = arith.constant 0 : i32
    return %1, %c0_i32 : i32, i32
  }
  func.func @transform_2(%arg0: i32, %arg1: i32) -> (i32, i32) {
    %c1_i32 = arith.constant 1 : i32
    %0 = arith.muli %arg0, %c1_i32 : i32
    %1 = arith.addi %0, %arg1 : i32
    %c0_i32 = arith.constant 0 : i32
    %c0_i32_0 = arith.constant 0 : i32
    return %1, %c0_i32 : i32, i32
  }
  func.func @transform_3(%arg0: i32, %arg1: i32) -> (i32, i32, i32) {
    %c0_i32 = arith.constant 0 : i32
    %c0_i32_0 = arith.constant 0 : i32
    %c0_i32_1 = arith.constant 0 : i32
    return %arg0, %c0_i32, %c0_i32_0 : i32, i32, i32
  }
}

</mosaic_0001>

<bundles_post_ra>
// kernel: tpu_custom_call.1
= control target key start
LH: loop header
LB: loop body
LE: loop exit
PB: predicated region body
PF: predicated region fallthrough
CT: control target
= control target key end

     0   :  { %8 = vsyncpa [#allocation3], 0  ;;  %s302_s0 = inlined_call_operand.hbm [shape: f32[16,128], index: 0, kind: input, shape index: {}]   ;;  %s303_s1 = inlined_call_operand.hbm [shape: f32[16,128], index: 1, kind: input, shape index: {}]   ;;  %s304_s2 = inlined_call_operand.hbm [shape: f32[16,128], index: 2, kind: input, shape index: {}]   ;;  %s305_s3 = inlined_call_operand.hbm [shape: f32[1,8,128], index: 3, kind: output, shape index: {}]  }
   0x1   :  { %9 = vsyncpa [#allocation6], 0 }
   0x2   :  { %10 = vsyncpa [#allocation4], 0  ;;  %s212_s12 = smov [#allocation5]   ;;  %s213_s14 = smov [#allocation2]  }
   0x3   :  { %s36_s13 = sshll.u32 %s212_s12, 4  ;;  %s20_s15 = sshll.u32 %s213_s14, 4  ;;  %s37_s13 = int_to_ptr.vmem [resolvable:$true] %s36_s13  ;;  %s238_s15 = int_to_ptr.vmem [resolvable:$true] %s20_s15 }
   0x4   :  { %s118_s18 = scalar_lea.hbm %s303_s1, 256 }
   0x5   :  { %p119_p0 = scmp.ne.s32.totalorder %s303_s1, %s118_s18  ;;  %p122_p1 = scmp.lt.u32.totalorder %s118_s18, %s303_s1 }
   0x7   :  { %p124_p2 = pnand %p122_p1, %p119_p0 }
   0x9   :  { %127 = shalt.err (!%p124_p2)
}
   0xa   :  { %s128_s23 = scalar_lea.vmem %s37_s13, 256  ;;  %p133_p4 = scmp.lt.s32.totalorder %s37_s13, %s37_s13 }
   0xb   :  { %p129_p3 = scmp.ne.s32.totalorder %s37_s13, %s128_s23  ;;  %p134_p5 = scmp.lt.s32.totalorder %s128_s23, %s128_s23 }
   0xd   :  { %p135_p6 = por %p134_p5, %p133_p4 }
   0xf   :  { %p136_p7 = pnand %p135_p6, %p129_p3 }
  0x11   :  { %139 = shalt.err (!%p136_p7)
}
  0x12   :  { %s214_s24 = smov 128   ;;  %s215_s25 = smov 8  }
  0x13   :  { %42 = dma.hbm_to_vmem [thread:$0]  %s303_s1, 256, %s37_s13, [#allocation6], %s214_s24, %s214_s24, %s215_s25  }
  0x14   :  { %s140_s30 = scalar_lea.hbm %s302_s0, 256 }
  0x15   :  { %p141_p8 = scmp.ne.s32.totalorder %s302_s0, %s140_s30  ;;  %p144_p9 = scmp.lt.u32.totalorder %s140_s30, %s302_s0 }
  0x17   :  { %p146_p10 = pnand %p144_p9, %p141_p8 }
  0x19   :  { %149 = shalt.err (!%p146_p10)
}
  0x1a   :  { %s150_s8 = scalar_lea.vmem %s238_s15, 256  ;;  %p155_p12 = scmp.lt.s32.totalorder %s238_s15, %s238_s15 }
  0x1b   :  { %p151_p11 = scmp.ne.s32.totalorder %s238_s15, %s150_s8  ;;  %p156_p13 = scmp.lt.s32.totalorder %s150_s8, %s150_s8 }
  0x1d   :  { %p157_p0 = por %p156_p13, %p155_p12 }
  0x1f   :  { %p158_p1 = pnand %p157_p0, %p151_p11 }
  0x21   :  { %161 = shalt.err (!%p158_p1)
}
  0x22   :  { %26 = dma.hbm_to_vmem [thread:$0]  %s302_s0, 256, %s238_s15, [#allocation3], %s214_s24, %s214_s24, %s215_s25  }
  0x23   :  { %s216_s10 = smov [#allocation7]   ;;  %s162_s14 = scalar_lea.hbm %s304_s2, 256 }
  0x24   :  { %s52_s11 = sshll.u32 %s216_s10, 4  ;;  %p163_p2 = scmp.ne.s32.totalorder %s304_s2, %s162_s14  ;;  %s53_s11 = int_to_ptr.vmem [resolvable:$true] %s52_s11 }
  0x25   :  { %p166_p3 = scmp.lt.u32.totalorder %s162_s14, %s304_s2 }
  0x27   :  { %p168_p4 = pnand %p166_p3, %p163_p2 }
  0x29   :  { %171 = shalt.err (!%p168_p4)
}
  0x2a   :  { %s172_s20 = scalar_lea.vmem %s53_s11, 256  ;;  %p177_p6 = scmp.lt.s32.totalorder %s53_s11, %s53_s11 }
  0x2b   :  { %p173_p5 = scmp.ne.s32.totalorder %s53_s11, %s172_s20  ;;  %p178_p7 = scmp.lt.s32.totalorder %s172_s20, %s172_s20 }
  0x2d   :  { %p179_p8 = por %p178_p7, %p177_p6 }
  0x2f   :  { %p180_p9 = pnand %p179_p8, %p173_p5 }
  0x31   :  { %183 = shalt.err (!%p180_p9)
}
  0x32   :  { %58 = dma.hbm_to_vmem [thread:$0]  %s304_s2, 256, %s53_s11, [#allocation6], %s214_s24, %s214_s24, %s215_s25  }
  0x33   :  { %206 = dma.done.wait [#allocation3], 256  }
  0x34   :  { %207 = vsyncadd [#allocation3], 4294967040 }
  0x35   :  { %208 = dma.done.wait [#allocation6], 512  }
  0x36   :  { %209 = vsyncadd [#allocation6], 4294966784  ;;  %v80_v0 = vld [vmem:[#allocation2] sm:$0xff]  ;;  %v81_v1 = vld [vmem:[#allocation2 + $0x8] sm:$0xff]  ;;  %s217_s21 = smov [#allocation8]  }
  0x37   :  { %v82_v2 = vld [vmem:[#allocation5] sm:$0xff]  ;;  %v83_v3 = vld [vmem:[#allocation5 + $0x8] sm:$0xff]  ;;  %v88_v6 = vld [vmem:[#allocation7] sm:$0xff]  ;;  %s101_s22 = sshll.u32 %s217_s21, 4  ;;  %s102_s22 = int_to_ptr.vmem [resolvable:$true] %s101_s22 }
  0x38   :  { %v84_v4 = vsub.f32 %v80_v0, %v82_v2  ;;  %v85_v5 = vsub.f32 %v81_v1, %v83_v3  ;;  %v89_v8 = vld [vmem:[#allocation7 + $0x8] sm:$0xff]  ;;  %s184_s2 = scalar_lea.vmem %s102_s22, 128  ;;  %p189_p11 = scmp.lt.s32.totalorder %s102_s22, %s102_s22 }
  0x39   :  { %p185_p10 = scmp.ne.s32.totalorder %s102_s22, %s184_s2  ;;  %p190_p12 = scmp.lt.s32.totalorder %s184_s2, %s184_s2 }
  0x3a   :  { %v86_v7 = vmul.f32 %v84_v4, %v84_v4  ;;  %v87_v9 = vmul.f32 %v85_v5, %v85_v5 }
  0x3b   :  { %p191_p13 = por %p190_p12, %p189_p11 }
  0x3c   :  { %v90_v10 = vmul.f32 %v88_v6, %v86_v7  ;;  %v91_v11 = vmul.f32 %v89_v8, %v87_v9 }
  0x3d   :  { %p192_p0 = pnand %p191_p13, %p185_p10 }
  0x3e   :  { %v92_v12 = vadd.f32 %v91_v11, %v90_v10 }
  0x40   :  { %94 = vst [vmem:[#allocation8] sm:$0xff] %v92_v12 }
  0x41   :  { %195 = shalt.err (!%p192_p0)
}
  0x42   :  { %s196_s25 = scalar_lea.hbm %s305_s3, 128 }
  0x43   :  { %p197_p1 = scmp.ne.s32.totalorder %s305_s3, %s196_s25  ;;  %p200_p2 = scmp.lt.u32.totalorder %s196_s25, %s305_s3 }
  0x45   :  { %p202_p3 = pnand %p200_p2, %p197_p1 }
  0x47   :  { %205 = shalt.err (!%p202_p3)
}
  0x48   :  { %104 = dma.vmem_to_hbm [thread:$0]  %s102_s22, 128, %s305_s3, [#allocation4]  }
  0x49   :  { %210 = dma.done.wait [#allocation4], 128  }
  0x4a   :  { %211 = vsyncadd [#allocation4], 4294967168 }
  0x4b   :  { %108 = vsyncpa [#allocation3], 1 }
  0x4c   :  { %109 = vsyncpa [#allocation6], 1 }
  0x4d   :  { %110 = vsyncpa [#allocation4], 1 }

</bundles_post_ra>
